<compile_context>
chip_gen: v7x
topology: tpu7x:2x2x1
jax: 0.10.0
libtpu: 0.0.40
codegen_flags: <defaults>
</compile_context>

<pallas_src>
import jax
import jax.numpy as jnp
from jax import lax
from jax.experimental import pallas as pl
from jax.experimental.pallas import tpu as pltpu


def _round_up(x, m):
    return ((x + m - 1) // m) * m


def _pick_k_tile(nfeat, tk):
    """Largest K tile <= tk that divides nfeat and keeps lanes full (mult of 128).
    Falls back to whole nfeat (no K tiling) when no such divisor exists."""
    if nfeat <= tk:
        return nfeat
    t = tk
    while t >= 128:
        if nfeat % t == 0 and t % 128 == 0:
            return t
        t //= 2
    return nfeat


def _sgc_linear_kernel(x_ref, w_ref, b_ref, o_ref, acc_ref):
    # x_ref:  (TM, TK)        VMEM   (streamed, double-buffered)
    # w_ref:  (NPAD, TK)      VMEM   (torch layout: class dim first, K last)
    # b_ref:  (1, NPAD)       VMEM   (resident: index_map constant)
    # o_ref:  (TM, NPAD)      VMEM   (lane-dense output block)
    # acc_ref:(TM, NPAD) f32  VMEM scratch accumulator
    k = pl.program_id(1)

    @pl.when(k == 0)
    def _():
        acc_ref[...] = jnp.zeros_like(acc_ref)

    # Contract the last dim of x with the last dim of W (no wrapper transpose).
    acc_ref[...] += lax.dot_general(
        x_ref[...], w_ref[...],
        dimension_numbers=(((1,), (1,)), ((), ())),
        preferred_element_type=jnp.float32,
    )

    @pl.when(k == pl.num_programs(1) - 1)
    def _():
        o_ref[...] = (acc_ref[...] + b_ref[...]).astype(o_ref.dtype)


def sgc_forward(x, W, b, *, tm=512, tk=512):
    """y = x @ W.T + b, matching torch.nn.Linear semantics.

    x: (N, nfeat)   W: (nclass, nfeat)   b: (nclass,)   ->  (N, nclass)
    """
    N, nfeat = x.shape
    nclass = W.shape[0]
    npad = _round_up(nclass, 128)           # lane-dense output width

    # Pad class dim once (weight/bias are tiny relative to the streamed x).
    Wp = jnp.pad(W, ((0, npad - nclass), (0, 0)))            # (npad, nfeat)
    bp = jnp.pad(b, (0, npad - nclass)).reshape(1, npad)     # (1, npad)

    # Row tile: big enough to pipeline; full-dim if N is small (satisfies the
    # (8,128) rule either by divisibility or by equaling the full array dim).
    TM = tm if N >= tm else N
    # K tile: only tile when it divides nfeat exactly (safe reduction blocks).
    TK = _pick_k_tile(nfeat, tk)

    grid = (pl.cdiv(N, TM), nfeat // TK)

    itemsize = jnp.dtype(x.dtype).itemsize
    cost = pl.CostEstimate(
        flops=2 * N * nfeat * npad,
        transcendentals=0,
        bytes_accessed=itemsize * (N * nfeat + npad * nfeat + npad + N * npad),
    )

    y_pad = pl.pallas_call(
        _sgc_linear_kernel,
        out_shape=jax.ShapeDtypeStruct((N, npad), x.dtype),
        grid_spec=pl.GridSpec(
            grid=grid,
            in_specs=[
                pl.BlockSpec((TM, TK), lambda i, k: (i, k)),      # x tiles (streamed)
                pl.BlockSpec((npad, TK), lambda i, k: (0, k)),    # W (resident over rows)
                pl.BlockSpec((1, npad), lambda i, k: (0, 0)),     # bias (resident)
            ],
            out_specs=pl.BlockSpec((TM, npad), lambda i, k: (i, 0)),
            scratch_shapes=[pltpu.VMEM((TM, npad), jnp.float32)],
        ),
        compiler_params=pltpu.CompilerParams(
            dimension_semantics=("parallel", "arbitrary"),
        ),
        cost_estimate=cost,
    )(x, Wp, bp)

    return y_pad[:, :nclass]


def init_sgc_params(key, nfeat, nclass, dtype=jnp.float32):
    """Deterministic init mimicking nn.Linear's uniform(-1/sqrt(fan_in), ...)."""
    k_w, k_b, k_w2, k_b2 = jax.random.split(key, 4)
    bound = 1.0 / float(jnp.sqrt(jnp.asarray(nfeat, jnp.float32)))
    return {
        "W_weight": jax.random.uniform(k_w, (nclass, nfeat), dtype, -bound, bound),
        "W_bias": jax.random.uniform(k_b, (nclass,), dtype, -bound, bound),
        # W2 exists in __init__ but is unused in forward — kept for shape fidelity.
        "W2_weight": jax.random.uniform(k_w2, (nfeat, nfeat), dtype, -bound, bound),
        "W2_bias": jax.random.uniform(k_b2, (nfeat,), dtype, -bound, bound),
    }


if __name__ == "__main__":
    key = jax.random.PRNGKey(0)
    k_x, k_p, k_x2, k_p2 = jax.random.split(key, 4)

    # --- small demo shapes consistent with the module -----------------------
    N, nfeat, nclass = 16, 32, 8
    x = jax.random.normal(k_x, (N, nfeat), dtype=jnp.float32)
    params = init_sgc_params(k_p, nfeat, nclass)

    y = sgc_forward(x, params["W_weight"], params["W_bias"])
    y = jax.block_until_ready(y)

    y_ref = x @ params["W_weight"].T + params["W_bias"]
    assert y.shape == (N, nclass)
    assert jnp.allclose(y, y_ref, atol=1e-3, rtol=1e-3)

    # --- larger shape exercising row tiling (partial edge block) + K tiling --
    N2, nfeat2, nclass2 = 1040, 1024, 10
    x2 = jax.random.normal(k_x2, (N2, nfeat2), dtype=jnp.float32)
    params2 = init_sgc_params(k_p2, nfeat2, nclass2)

    y2 = sgc_forward(x2, params2["W_weight"], params2["W_bias"])
    y2 = jax.block_until_ready(y2)

    y2_ref = x2 @ params2["W_weight"].T + params2["W_bias"]
    assert y2.shape == (N2, nclass2)
    assert jnp.allclose(y2, y2_ref, atol=2e-3, rtol=2e-3)

    print("KERNEL_OK")
</pallas_src>

<mosaic_0001>
module attributes {stable_mosaic.version = 11 : i64} {
  func.func @_sgc_linear_kernel(%arg0: i32, %arg1: i32, %arg2: memref<16x32xf32, #tpu.memory_space<vmem>>, %arg3: memref<128x32xf32, #tpu.memory_space<vmem>>, %arg4: memref<1x128xf32, #tpu.memory_space<vmem>>, %arg5: memref<16x128xf32, #tpu.memory_space<vmem>>, %arg6: memref<16x128xf32, #tpu.memory_space<vmem>>) attributes {dimension_semantics = [#tpu.dimension_semantics<parallel>, #tpu.dimension_semantics<arbitrary>], iteration_bounds = array<i64: 1, 1>, scalar_prefetch = 0 : i64, scratch_operands = 1 : i64, tpu.core_type = #tpu.core_type<tc>, window_params = [{transform_indices = @transform_0, window_bounds = array<i64: 16, 32>}, {transform_indices = @transform_1, window_bounds = array<i64: 128, 32>}, {pipeline_mode = #tpu.pipeline_mode<synchronous>, transform_indices = @transform_2, window_bounds = array<i64: 1, 128>}, {transform_indices = @transform_3, window_bounds = array<i64: 16, 128>}]} {
    %c0_i32 = arith.constant 0 : i32
    %0 = arith.cmpi eq, %arg1, %c0_i32 : i32
    %1 = arith.extui %0 : i1 to i32
    %c0_i32_0 = arith.constant 0 : i32
    %2 = arith.cmpi ne, %1, %c0_i32_0 : i32
    scf.if %2 {
      %cst_10 = arith.constant 0.000000e+00 : f32
      %12 = vector.broadcast %cst_10 : f32 to vector<16x128xf32>
      %c0_11 = arith.constant 0 : index
      %c0_12 = arith.constant 0 : index
      %13 = vector.load %arg6[%c0_11, %c0_12] : memref<16x128xf32, #tpu.memory_space<vmem>>, vector<16x128xf32>
      tpu.vector_store %arg6[%c0_11, %c0_12], %12 {strides = array<i32>} : memref<16x128xf32, #tpu.memory_space<vmem>>, vector<16x128xf32>,
    } else {
    }
    %c0 = arith.constant 0 : index
    %c0_1 = arith.constant 0 : index
    %3 = vector.load %arg6[%c0, %c0_1] : memref<16x128xf32, #tpu.memory_space<vmem>>, vector<16x128xf32>
    %c0_2 = arith.constant 0 : index
    %c0_3 = arith.constant 0 : index
    %4 = vector.load %arg2[%c0_2, %c0_3] : memref<16x32xf32, #tpu.memory_space<vmem>>, vector<16x32xf32>
    %c0_4 = arith.constant 0 : index
    %c0_5 = arith.constant 0 : index
    %5 = vector.load %arg3[%c0_4, %c0_5] : memref<128x32xf32, #tpu.memory_space<vmem>>, vector<128x32xf32>
    %cst = arith.constant dense<0.000000e+00> : vector<16x128xf32>
    %6 = tpu.matmul %4, %5, %cst {dimension_numbers = #tpu.dot_dimension_numbers<[1], [1], [0], [0], [0, 0, 1, 0], [], []>} : vector<16x32xf32>, vector<128x32xf32>, vector<16x128xf32> -> vector<16x128xf32>
    %7 = arith.addf %3, %6 : vector<16x128xf32>
    %c0_6 = arith.constant 0 : index
    %c0_7 = arith.constant 0 : index
    %8 = vector.load %arg6[%c0_6, %c0_7] : memref<16x128xf32, #tpu.memory_space<vmem>>, vector<16x128xf32>
    tpu.vector_store %arg6[%c0_6, %c0_7], %7 {strides = array<i32>} : memref<16x128xf32, #tpu.memory_space<vmem>>, vector<16x128xf32>,
    %c0_i32_8 = arith.constant 0 : i32
    %9 = arith.cmpi eq, %arg1, %c0_i32_8 : i32
    %10 = arith.extui %9 : i1 to i32
    %c0_i32_9 = arith.constant 0 : i32
    %11 = arith.cmpi ne, %10, %c0_i32_9 : i32
    scf.if %11 {
      %c0_10 = arith.constant 0 : index
      %c0_11 = arith.constant 0 : index
      %12 = vector.load %arg6[%c0_10, %c0_11] : memref<16x128xf32, #tpu.memory_space<vmem>>, vector<16x128xf32>
      %c0_12 = arith.constant 0 : index
      %c0_13 = arith.constant 0 : index
      %13 = vector.load %arg4[%c0_12, %c0_13] : memref<1x128xf32, #tpu.memory_space<vmem>>, vector<1x128xf32>
      %14 = vector.broadcast %13 : vector<1x128xf32> to vector<16x128xf32>
      %15 = arith.addf %12, %14 : vector<16x128xf32>
      %c0_14 = arith.constant 0 : index
      %c0_15 = arith.constant 0 : index
      %16 = vector.load %arg5[%c0_14, %c0_15] : memref<16x128xf32, #tpu.memory_space<vmem>>, vector<16x128xf32>
      tpu.vector_store %arg5[%c0_14, %c0_15], %15 {strides = array<i32>} : memref<16x128xf32, #tpu.memory_space<vmem>>, vector<16x128xf32>,
    } else {
    }
    return
  }
  func.func @transform_0(%arg0: i32, %arg1: i32) -> (i32, i32) {
    %c0_i32 = arith.constant 0 : i32
    return %arg0, %arg1 : i32, i32
  }
  func.func @transform_1(%arg0: i32, %arg1: i32) -> (i32, i32) {
    %c0_i32 = arith.constant 0 : i32
    %c0_i32_0 = arith.constant 0 : i32
    return %c0_i32, %arg1 : i32, i32
  }
  func.func @transform_2(%arg0: i32, %arg1: i32) -> (i32, i32) {
    %c0_i32 = arith.constant 0 : i32
    %c0_i32_0 = arith.constant 0 : i32
    %c0_i32_1 = arith.constant 0 : i32
    return %c0_i32, %c0_i32_0 : i32, i32
  }
  func.func @transform_3(%arg0: i32, %arg1: i32) -> (i32, i32) {
    %c0_i32 = arith.constant 0 : i32
    %c0_i32_0 = arith.constant 0 : i32
    return %arg0, %c0_i32 : i32, i32
  }
}

</mosaic_0001>

<bundles_post_ra>
// kernel: tpu_custom_call.1
= control target key start
LH: loop header
LB: loop body
LE: loop exit
PB: predicated region body
PF: predicated region fallthrough
CT: control target
= control target key end

     0   :  { %vm41_vm0 = vcmask 261120   ;;  %s486_s0 = inlined_call_operand.vmem [shape: f32[16,32], index: 0, kind: input, shape index: {}]   ;;  %s487_s1 = inlined_call_operand.vmem [shape: f32[128,32], index: 1, kind: input, shape index: {}]   ;;  %s488_s2 = inlined_call_operand.vmem [shape: f32[1,128], index: 2, kind: input, shape index: {}]   ;;  %s489_s3 = inlined_call_operand.hbm [shape: f32[16,128], index: 3, kind: output, shape index: {}]  }
   0x1   :  { %v25_v0 = vld [vmem:[%s487_s1] sm:$0xff]  ;;  %v26_v1 = vld [vmem:[%s487_s1 + $0x8] sm:$0xff]  ;;  %v27_v2 = vld [vmem:[%s487_s1 + $0x10] sm:$0xff] }
   0x2   :  { %v279_v3 = vpack.c.bf16 %v26_v1, %v25_v0  ;;  %vm388_vm1 = vmpackc.low %vm41_vm0, %vm41_vm0  ;;  %v28_v5 = vld [vmem:[%s487_s1 + $0x18] sm:$0xff]  ;;  %v23_v7 = vld [vmem:[%s486_s0] sm:$0xff] }
   0x3   :  { %v285_v6 = vpack.c.bf16 %v28_v5, %v27_v2  ;;  %v29_v8 = vld [vmem:[%s487_s1 + $0x20] sm:$0xff]  ;;  %v30_v9 = vld [vmem:[%s487_s1 + $0x28] sm:$0xff]  ;;  %276 = vmatprep.mubr.msk.f32.mxu0 %vm41_vm0, %v23_v7 }
   0x4   :  { %281 = vmatprep.subr.msk.bf16.mxu0 %vm388_vm1, %v279_v3 }
   0x5   :  { %284 = vmatpush3.bf16.xpose.msk.msra.mxu0 %vm388_vm1, %v279_v3 }
   0x6   :  { %287 = vmatprep.subr.msk.bf16.mxu0 %vm388_vm1, %v285_v6 }
   0x7   :  { %8 = vsyncpa [#allocation4], 0  ;;  %v291_v10 = vpack.c.bf16 %v30_v9, %v29_v8  ;;  %v31_v11 = vld [vmem:[%s487_s1 + $0x30] sm:$0xff]  ;;  %v32_v12 = vld [vmem:[%s487_s1 + $0x38] sm:$0xff] }
   0x8   :  { %v297_v13 = vpack.c.bf16 %v32_v12, %v31_v11  ;;  %v33_v14 = vld [vmem:[%s487_s1 + $0x40] sm:$0xff]  ;;  %v34_v15 = vld [vmem:[%s487_s1 + $0x48] sm:$0xff]  ;;  %v35_v17 = vld [vmem:[%s487_s1 + $0x50] sm:$0xff] }
   0x9   :  { %v303_v16 = vpack.c.bf16 %v34_v15, %v33_v14  ;;  %v36_v18 = vld [vmem:[%s487_s1 + $0x58] sm:$0xff]  ;;  %v37_v20 = vld [vmem:[%s487_s1 + $0x60] sm:$0xff]  ;;  %v38_v21 = vld [vmem:[%s487_s1 + $0x68] sm:$0xff] }
   0xa   :  { %v309_v19 = vpack.c.bf16 %v36_v18, %v35_v17  ;;  %v315_v22 = vpack.c.bf16 %v38_v21, %v37_v20  ;;  %v39_v23 = vld [vmem:[%s487_s1 + $0x70] sm:$0xff]  ;;  %v40_v24 = vld [vmem:[%s487_s1 + $0x78] sm:$0xff]  ;;  %v24_v26 = vld [vmem:[%s486_s0 + $0x8] sm:$0xff]  ;;  %s354_s1 = smov [#allocation3]  }
   0xb   :  { %v321_v25 = vpack.c.bf16 %v40_v24, %v39_v23  ;;  %v225_v27 = vld [vmem:[%s488_s2] ss:$0 sm:$0xff]  ;;  %s196_s23 = sshll.u32 %s354_s1, 4  ;;  %s197_s23 = int_to_ptr.vmem [resolvable:$true] %s196_s23 }
   0xc   :  { %s330_s24 = scalar_lea.vmem %s197_s23, 256  ;;  %p335_p1 = scmp.lt.s32.totalorder %s197_s23, %s197_s23 }
   0xd   :  { %290 = vmatpush3.bf16.xpose.msk.msra.mxu0 %vm388_vm1, %v285_v6  ;;  %p331_p0 = scmp.ne.s32.totalorder %s197_s23, %s330_s24  ;;  %p336_p2 = scmp.lt.s32.totalorder %s330_s24, %s330_s24 }
   0xe   :  { %293 = vmatprep.subr.msk.bf16.mxu0 %vm388_vm1, %v291_v10 }
   0xf   :  { %p337_p3 = por %p336_p2, %p335_p1 }
  0x11   :  { %p338_p4 = pnand %p337_p3, %p331_p0 }
  0x15   :  { %296 = vmatpush3.bf16.xpose.msk.msra.mxu0 %vm388_vm1, %v291_v10 }
  0x16   :  { %299 = vmatprep.subr.msk.bf16.mxu0 %vm388_vm1, %v297_v13 }
  0x1d   :  { %302 = vmatpush3.bf16.xpose.msk.msra.mxu0 %vm388_vm1, %v297_v13 }
  0x1e   :  { %305 = vmatprep.subr.msk.bf16.mxu0 %vm388_vm1, %v303_v16 }
  0x25   :  { %308 = vmatpush3.bf16.xpose.msk.msra.mxu0 %vm388_vm1, %v303_v16 }
  0x26   :  { %311 = vmatprep.subr.msk.bf16.mxu0 %vm388_vm1, %v309_v19 }
  0x2d   :  { %314 = vmatpush3.bf16.xpose.msk.msra.mxu0 %vm388_vm1, %v309_v19 }
  0x2e   :  { %317 = vmatprep.subr.msk.bf16.mxu0 %vm388_vm1, %v315_v22 }
  0x35   :  { %320 = vmatpush3.bf16.xpose.msk.msra.mxu0 %vm388_vm1, %v315_v22 }
  0x36   :  { %323 = vmatprep.subr.msk.bf16.mxu0 %vm388_vm1, %v321_v25 }
  0x3d   :  { %326 = vmatpush3.bf16.xpose.msk.msra.mxu0 %vm388_vm1, %v321_v25 }
  0x44   :  { %277 = vmatmul.mubr.msk.f32.vlgmr.msra.gmra.mrb[0].mxu0 %vm41_vm0, %v24_v26 }
 0x117   :  { %v278_v28 = vpop.f32.mrb[0].mxu0 }
 0x118   :  { %v188_v29 = vadd.f32 %v278_v28, %v225_v27  ;;  %v162_v30 = vpop.f32.mrb[1].mxu0 }
 0x119   :  { %v187_v31 = vadd.f32 %v225_v27, %v162_v30 }
 0x11a   :  { %190 = vst [vmem:[#allocation3 + $0x8] sm:$0xff] %v188_v29 }
 0x11b   :  { %189 = vst [vmem:[#allocation3] sm:$0xff] %v187_v31 }
 0x11c   :  { %341 = shalt.err (!%p338_p4)
}
 0x11d   :  { %s342_s2 = scalar_lea.hbm %s489_s3, 256 }
 0x11e   :  { %p343_p5 = scmp.ne.s32.totalorder %s489_s3, %s342_s2  ;;  %p346_p6 = scmp.lt.u32.totalorder %s342_s2, %s489_s3 }
 0x120   :  { %p348_p7 = pnand %p346_p6, %p343_p5 }
 0x122   :  { %351 = shalt.err (!%p348_p7)
}
 0x123   :  { %s355_s30 = smov 128   ;;  %s356_s4 = smov 8  }
 0x124   :  { %202 = dma.vmem_to_hbm [thread:$0]  %s197_s23, 256, %s489_s3, [#allocation4], %s355_s30, %s355_s30, %s356_s4  }
 0x125   :  { %352 = dma.done.wait [#allocation4], 256  }
 0x126   :  { %353 = vsyncadd [#allocation4], 4294967040 }
 0x127   :  { %206 = vsyncpa [#allocation4], 1 }

</bundles_post_ra>
